<compile_context>
chip_gen: v5e
topology: v5e:2x2
jax: 0.10.0
libtpu: 0.0.40
codegen_flags: <defaults>
</compile_context>

<pallas_src>
import functools
import math

import jax
import jax.numpy as jnp
from jax import lax
from jax.experimental import pallas as pl
from jax.experimental.pallas import tpu as pltpu

# ----------------------------- configuration -----------------------------
D_MODEL = 32       # embed_dim
NHEAD = 4          # num_heads
HEAD_DIM = D_MODEL // NHEAD
B = 2              # batch
LQ = 8             # target (query) sequence length
LK = 8             # memory (key/value) sequence length


# ------------------------------- kernel ----------------------------------
def mha_kernel(xm_ref, w_ref, b_ref, out_ref,
               *, batch, lq, lk, nhead, head_dim, d_model):
    """Full multi-head cross-attention in one grid-less invocation.

    xm_ref : (batch*lq + batch*lk, E)  [flattened tgt rows ; flattened memory rows]
    w_ref  : (E, 4E)  [Wq^T * 1/sqrt(Dh) | Wk^T | Wv^T | Wo^T]
    b_ref  : (1, 4E)  [bq * 1/sqrt(Dh) | bk | bv | bo]
    out_ref: (batch*lq, E)
    """
    xm = xm_ref[...]
    w = w_ref[...]
    bias = b_ref[...]

    nx = batch * lq                      # number of tgt rows in the slab
    e3 = 3 * d_model

    # ---- fused Q|K|V in-projection: one MXU pass over the stacked slab ----
    # q lives in the x-rows / cols [0:E); k,v live in the m-rows / cols [E:3E).
    # The "wrong" quadrants (bias included) are computed and discarded — the
    # MXU is far from saturated, so they are free.
    proj = (jnp.dot(xm, w[:, :e3], preferred_element_type=jnp.float32)
            + bias[:, :e3])

    # ---- phase 1: all S = q @ k^T matmuls, stacked along sublanes ----------
    s_list = []
    for b in range(batch):
        q_b = proj[b * lq:(b + 1) * lq, :d_model]                      # (lq, E)
        k_b = proj[nx + b * lk: nx + (b + 1) * lk, d_model:2 * d_model]  # (lk, E)
        for h in range(nhead):
            lo = h * head_dim
            qh = q_b[:, lo:lo + head_dim]                              # (lq, Dh)
            kh = k_b[:, lo:lo + head_dim]                              # (lk, Dh)
            # q @ k^T without an explicit transpose (contract last dims).
            s_list.append(lax.dot_general(qh, kh, (((1,), (1,)), ((), ())),
                                          preferred_element_type=jnp.float32))
    s = jnp.concatenate(s_list, axis=0)          # (batch*nhead*lq, lk)

    # ---- phase 2: one softmax over the whole stack (rows are independent) --
    mmax = jnp.max(s, axis=-1, keepdims=True)
    ex = jnp.exp(s - mmax)
    inv = pl.reciprocal(jnp.sum(ex, axis=-1, keepdims=True), approx=False)
    p = ex * inv

    # ---- phase 3: all P @ V matmuls; contexts stay in registers ------------
    ctx_rows = []
    idx = 0
    for b in range(batch):
        v_b = proj[nx + b * lk: nx + (b + 1) * lk, 2 * d_model:e3]     # (lk, E)
        heads = []
        for h in range(nhead):
            lo = h * head_dim
            ph = p[idx * lq:(idx + 1) * lq, :]                         # (lq, lk)
            vh = v_b[:, lo:lo + head_dim]                              # (lk, Dh)
            heads.append(jnp.dot(ph, vh, preferred_element_type=jnp.float32))
            idx += 1
        ctx_rows.append(jnp.concatenate(heads, axis=-1))               # (lq, E)
    ctx = jnp.concatenate(ctx_rows, axis=0)                            # (B*lq, E)

    # ---- fused output projection -------------------------------------------
    out_ref[...] = (jnp.dot(ctx, w[:, e3:], preferred_element_type=jnp.float32)
                    + bias[:, e3:]).astype(out_ref.dtype)


# ------------------------------- wrapper ----------------------------------
@jax.jit
def transformer_decoder_layer2(tgt, memory, params):
    """tgt: (B, LQ, E), memory: (B, LK, E) -> attn_output: (B, LQ, E)."""
    wq, wk, wv, wo, bq, bk, bv, bo = params
    Bb, Lq, E = tgt.shape
    _, Lk, _ = memory.shape
    head_dim = E // NHEAD
    scale = 1.0 / math.sqrt(head_dim)

    # Wrapper-side layout plumbing (free at the XLA level):
    #   * one activation slab [x ; m]
    #   * one weight slab  [Wq^T*scale | Wk^T | Wv^T | Wo^T]   (E, 4E) lane-dense
    #   * one bias slab    [bq*scale | bk | bv | bo]           (1, 4E)
    xm = jnp.concatenate([tgt.reshape(Bb * Lq, E),
                          memory.reshape(Bb * Lk, E)], axis=0)
    w_slab = jnp.concatenate([wq.T * scale, wk.T, wv.T, wo.T], axis=1)
    b_slab = jnp.concatenate([bq * scale, bk, bv, bo], axis=1)

    vmem = pl.BlockSpec(memory_space=pltpu.MemorySpace.VMEM)

    kernel = functools.partial(
        mha_kernel, batch=Bb, lq=Lq, lk=Lk,
        nhead=NHEAD, head_dim=head_dim, d_model=E)

    out = pl.pallas_call(
        kernel,
        out_shape=jax.ShapeDtypeStruct((Bb * Lq, E), tgt.dtype),
        in_specs=[vmem, vmem, vmem],     # no grid -> no pipeline overhead
        out_specs=vmem,
    )(xm, w_slab, b_slab)

    return out.reshape(Bb, Lq, E)


# --------------------------- pure-JAX reference ----------------------------
def mha_reference(tgt, memory, params):
    wq, wk, wv, wo, bq, bk, bv, bo = params
    q = tgt @ wq.T + bq
    k = memory @ wk.T + bk
    v = memory @ wv.T + bv
    Bb, Lq, E = q.shape
    Lk = k.shape[1]
    q = q.reshape(Bb, Lq, NHEAD, HEAD_DIM).transpose(0, 2, 1, 3)
    k = k.reshape(Bb, Lk, NHEAD, HEAD_DIM).transpose(0, 2, 1, 3)
    v = v.reshape(Bb, Lk, NHEAD, HEAD_DIM).transpose(0, 2, 1, 3)
    s = jnp.einsum("bhqd,bhkd->bhqk", q, k) / math.sqrt(HEAD_DIM)
    p = jax.nn.softmax(s, axis=-1)
    ctx = jnp.einsum("bhqk,bhkd->bhqd", p, v)
    ctx = ctx.transpose(0, 2, 1, 3).reshape(Bb, Lq, E)
    return ctx @ wo.T + bo


# --------------------------------- main ------------------------------------
if __name__ == "__main__":
    key = jax.random.PRNGKey(0)
    keys = jax.random.split(key, 10)

    # Deterministic synthetic parameters (same shapes as nn.MultiheadAttention:
    # in_proj split into Wq/Wk/Wv of (E,E), out_proj (E,E), biases (1,E)).
    scale = 1.0 / math.sqrt(D_MODEL)
    wq = jax.random.uniform(keys[0], (D_MODEL, D_MODEL), jnp.float32, -scale, scale)
    wk = jax.random.uniform(keys[1], (D_MODEL, D_MODEL), jnp.float32, -scale, scale)
    wv = jax.random.uniform(keys[2], (D_MODEL, D_MODEL), jnp.float32, -scale, scale)
    wo = jax.random.uniform(keys[3], (D_MODEL, D_MODEL), jnp.float32, -scale, scale)
    bq = jax.random.uniform(keys[6], (1, D_MODEL), jnp.float32, -scale, scale)
    bk = jax.random.uniform(keys[7], (1, D_MODEL), jnp.float32, -scale, scale)
    bv = jax.random.uniform(keys[8], (1, D_MODEL), jnp.float32, -scale, scale)
    bo = jax.random.uniform(keys[9], (1, D_MODEL), jnp.float32, -scale, scale)
    params = (wq, wk, wv, wo, bq, bk, bv, bo)

    tgt = jax.random.normal(keys[4], (B, LQ, D_MODEL), jnp.float32)
    memory = jax.random.normal(keys[5], (B, LK, D_MODEL), jnp.float32)

    out = transformer_decoder_layer2(tgt, memory, params)
    out = jax.block_until_ready(out)

    ref = mha_reference(tgt, memory, params)
    assert out.shape == (B, LQ, D_MODEL)
    assert jnp.allclose(out, ref, atol=1e-5, rtol=1e-5), "kernel mismatch vs reference"

    print("KERNEL_OK")
</pallas_src>

<mosaic_0001>
module attributes {stable_mosaic.version = 11 : i64} {
  func.func @mha_kernel(%arg0: memref<32x32xf32, #tpu.memory_space<vmem>>, %arg1: memref<32x128xf32, #tpu.memory_space<vmem>>, %arg2: memref<1x128xf32, #tpu.memory_space<vmem>>, %arg3: memref<16x32xf32, #tpu.memory_space<vmem>>) attributes {dimension_semantics = [], scalar_prefetch = 0 : i64, scratch_operands = 0 : i64, tpu.core_type = #tpu.core_type<tc>} {
    %c0 = arith.constant 0 : index
    %c0_0 = arith.constant 0 : index
    %0 = vector.load %arg0[%c0, %c0_0] : memref<32x32xf32, #tpu.memory_space<vmem>>, vector<32x32xf32>
    %c0_1 = arith.constant 0 : index
    %c0_2 = arith.constant 0 : index
    %1 = vector.load %arg1[%c0_1, %c0_2] : memref<32x128xf32, #tpu.memory_space<vmem>>, vector<32x128xf32>
    %c0_3 = arith.constant 0 : index
    %c0_4 = arith.constant 0 : index
    %2 = vector.load %arg2[%c0_3, %c0_4] : memref<1x128xf32, #tpu.memory_space<vmem>>, vector<1x128xf32>
    %3 = vector.extract_strided_slice %1 {offsets = [0, 0], sizes = [32, 96], strides = [1, 1]} : vector<32x128xf32> to vector<32x96xf32>
    %cst = arith.constant dense<0.000000e+00> : vector<32x96xf32>
    %4 = tpu.matmul %0, %3, %cst {dimension_numbers = #tpu.dot_dimension_numbers<[1], [0], [0], [1], [0, 0, 1, 1], [], []>} : vector<32x32xf32>, vector<32x96xf32>, vector<32x96xf32> -> vector<32x96xf32>
    %5 = vector.extract_strided_slice %2 {offsets = [0, 0], sizes = [1, 96], strides = [1, 1]} : vector<1x128xf32> to vector<1x96xf32>
    %6 = vector.broadcast %5 : vector<1x96xf32> to vector<32x96xf32>
    %7 = arith.addf %4, %6 : vector<32x96xf32>
    %8 = vector.extract_strided_slice %7 {offsets = [0, 0], sizes = [8, 32], strides = [1, 1]} : vector<32x96xf32> to vector<8x32xf32>
    %9 = vector.extract_strided_slice %7 {offsets = [16, 32], sizes = [8, 32], strides = [1, 1]} : vector<32x96xf32> to vector<8x32xf32>
    %10 = vector.extract_strided_slice %8 {offsets = [0, 0], sizes = [8, 8], strides = [1, 1]} : vector<8x32xf32> to vector<8x8xf32>
    %11 = vector.extract_strided_slice %9 {offsets = [0, 0], sizes = [8, 8], strides = [1, 1]} : vector<8x32xf32> to vector<8x8xf32>
    %cst_5 = arith.constant dense<0.000000e+00> : vector<8x8xf32>
    %12 = tpu.matmul %10, %11, %cst_5 {dimension_numbers = #tpu.dot_dimension_numbers<[1], [1], [0], [0], [0, 0, 1, 0], [], []>} : vector<8x8xf32>, vector<8x8xf32>, vector<8x8xf32> -> vector<8x8xf32>
    %13 = vector.extract_strided_slice %8 {offsets = [0, 8], sizes = [8, 8], strides = [1, 1]} : vector<8x32xf32> to vector<8x8xf32>
    %14 = vector.extract_strided_slice %9 {offsets = [0, 8], sizes = [8, 8], strides = [1, 1]} : vector<8x32xf32> to vector<8x8xf32>
    %cst_6 = arith.constant dense<0.000000e+00> : vector<8x8xf32>
    %15 = tpu.matmul %13, %14, %cst_6 {dimension_numbers = #tpu.dot_dimension_numbers<[1], [1], [0], [0], [0, 0, 1, 0], [], []>} : vector<8x8xf32>, vector<8x8xf32>, vector<8x8xf32> -> vector<8x8xf32>
    %16 = vector.extract_strided_slice %8 {offsets = [0, 16], sizes = [8, 8], strides = [1, 1]} : vector<8x32xf32> to vector<8x8xf32>
    %17 = vector.extract_strided_slice %9 {offsets = [0, 16], sizes = [8, 8], strides = [1, 1]} : vector<8x32xf32> to vector<8x8xf32>
    %cst_7 = arith.constant dense<0.000000e+00> : vector<8x8xf32>
    %18 = tpu.matmul %16, %17, %cst_7 {dimension_numbers = #tpu.dot_dimension_numbers<[1], [1], [0], [0], [0, 0, 1, 0], [], []>} : vector<8x8xf32>, vector<8x8xf32>, vector<8x8xf32> -> vector<8x8xf32>
    %19 = vector.extract_strided_slice %8 {offsets = [0, 24], sizes = [8, 8], strides = [1, 1]} : vector<8x32xf32> to vector<8x8xf32>
    %20 = vector.extract_strided_slice %9 {offsets = [0, 24], sizes = [8, 8], strides = [1, 1]} : vector<8x32xf32> to vector<8x8xf32>
    %cst_8 = arith.constant dense<0.000000e+00> : vector<8x8xf32>
    %21 = tpu.matmul %19, %20, %cst_8 {dimension_numbers = #tpu.dot_dimension_numbers<[1], [1], [0], [0], [0, 0, 1, 0], [], []>} : vector<8x8xf32>, vector<8x8xf32>, vector<8x8xf32> -> vector<8x8xf32>
    %22 = vector.extract_strided_slice %7 {offsets = [8, 0], sizes = [8, 32], strides = [1, 1]} : vector<32x96xf32> to vector<8x32xf32>
    %23 = vector.extract_strided_slice %7 {offsets = [24, 32], sizes = [8, 32], strides = [1, 1]} : vector<32x96xf32> to vector<8x32xf32>
    %24 = vector.extract_strided_slice %22 {offsets = [0, 0], sizes = [8, 8], strides = [1, 1]} : vector<8x32xf32> to vector<8x8xf32>
    %25 = vector.extract_strided_slice %23 {offsets = [0, 0], sizes = [8, 8], strides = [1, 1]} : vector<8x32xf32> to vector<8x8xf32>
    %cst_9 = arith.constant dense<0.000000e+00> : vector<8x8xf32>
    %26 = tpu.matmul %24, %25, %cst_9 {dimension_numbers = #tpu.dot_dimension_numbers<[1], [1], [0], [0], [0, 0, 1, 0], [], []>} : vector<8x8xf32>, vector<8x8xf32>, vector<8x8xf32> -> vector<8x8xf32>
    %27 = vector.extract_strided_slice %22 {offsets = [0, 8], sizes = [8, 8], strides = [1, 1]} : vector<8x32xf32> to vector<8x8xf32>
    %28 = vector.extract_strided_slice %23 {offsets = [0, 8], sizes = [8, 8], strides = [1, 1]} : vector<8x32xf32> to vector<8x8xf32>
    %cst_10 = arith.constant dense<0.000000e+00> : vector<8x8xf32>
    %29 = tpu.matmul %27, %28, %cst_10 {dimension_numbers = #tpu.dot_dimension_numbers<[1], [1], [0], [0], [0, 0, 1, 0], [], []>} : vector<8x8xf32>, vector<8x8xf32>, vector<8x8xf32> -> vector<8x8xf32>
    %30 = vector.extract_strided_slice %22 {offsets = [0, 16], sizes = [8, 8], strides = [1, 1]} : vector<8x32xf32> to vector<8x8xf32>
    %31 = vector.extract_strided_slice %23 {offsets = [0, 16], sizes = [8, 8], strides = [1, 1]} : vector<8x32xf32> to vector<8x8xf32>
    %cst_11 = arith.constant dense<0.000000e+00> : vector<8x8xf32>
    %32 = tpu.matmul %30, %31, %cst_11 {dimension_numbers = #tpu.dot_dimension_numbers<[1], [1], [0], [0], [0, 0, 1, 0], [], []>} : vector<8x8xf32>, vector<8x8xf32>, vector<8x8xf32> -> vector<8x8xf32>
    %33 = vector.extract_strided_slice %22 {offsets = [0, 24], sizes = [8, 8], strides = [1, 1]} : vector<8x32xf32> to vector<8x8xf32>
    %34 = vector.extract_strided_slice %23 {offsets = [0, 24], sizes = [8, 8], strides = [1, 1]} : vector<8x32xf32> to vector<8x8xf32>
    %cst_12 = arith.constant dense<0.000000e+00> : vector<8x8xf32>
    %35 = tpu.matmul %33, %34, %cst_12 {dimension_numbers = #tpu.dot_dimension_numbers<[1], [1], [0], [0], [0, 0, 1, 0], [], []>} : vector<8x8xf32>, vector<8x8xf32>, vector<8x8xf32> -> vector<8x8xf32>
    %36 = tpu.concatenate %12, %15, %18, %21, %26, %29, %32, %35 in 0 : vector<8x8xf32>, vector<8x8xf32>, vector<8x8xf32>, vector<8x8xf32>, vector<8x8xf32>, vector<8x8xf32>, vector<8x8xf32>, vector<8x8xf32> -> vector<64x8xf32>
    %cst_13 = arith.constant dense<0xFF800000> : vector<64xf32>
    %37 = vector.multi_reduction <maximumf>, %36, %cst_13 [1] : vector<64x8xf32> to vector<64xf32>
    %38 = vector.shape_cast %37 : vector<64xf32> to vector<64x1xf32>
    %39 = vector.broadcast %38 : vector<64x1xf32> to vector<64x8xf32>
    %40 = arith.subf %36, %39 : vector<64x8xf32>
    %41 = math.exp %40 : vector<64x8xf32>
    %cst_14 = arith.constant dense<0.000000e+00> : vector<64xf32>
    %42 = vector.multi_reduction <add>, %41, %cst_14 [1] : vector<64x8xf32> to vector<64xf32>
    %43 = vector.shape_cast %42 : vector<64xf32> to vector<64x1xf32>
    %44 = tpu.reciprocal %43 : vector<64x1xf32> -> vector<64x1xf32>
    %45 = vector.broadcast %44 : vector<64x1xf32> to vector<64x8xf32>
    %46 = arith.mulf %41, %45 : vector<64x8xf32>
    %47 = vector.extract_strided_slice %7 {offsets = [16, 64], sizes = [8, 32], strides = [1, 1]} : vector<32x96xf32> to vector<8x32xf32>
    %48 = vector.extract_strided_slice %46 {offsets = [0, 0], sizes = [8, 8], strides = [1, 1]} : vector<64x8xf32> to vector<8x8xf32>
    %49 = vector.extract_strided_slice %47 {offsets = [0, 0], sizes = [8, 8], strides = [1, 1]} : vector<8x32xf32> to vector<8x8xf32>
    %cst_15 = arith.constant dense<0.000000e+00> : vector<8x8xf32>
    %50 = tpu.matmul %48, %49, %cst_15 {dimension_numbers = #tpu.dot_dimension_numbers<[1], [0], [0], [1], [0, 0, 1, 1], [], []>} : vector<8x8xf32>, vector<8x8xf32>, vector<8x8xf32> -> vector<8x8xf32>
    %51 = vector.extract_strided_slice %46 {offsets = [8, 0], sizes = [8, 8], strides = [1, 1]} : vector<64x8xf32> to vector<8x8xf32>
    %52 = vector.extract_strided_slice %47 {offsets = [0, 8], sizes = [8, 8], strides = [1, 1]} : vector<8x32xf32> to vector<8x8xf32>
    %cst_16 = arith.constant dense<0.000000e+00> : vector<8x8xf32>
    %53 = tpu.matmul %51, %52, %cst_16 {dimension_numbers = #tpu.dot_dimension_numbers<[1], [0], [0], [1], [0, 0, 1, 1], [], []>} : vector<8x8xf32>, vector<8x8xf32>, vector<8x8xf32> -> vector<8x8xf32>
    %54 = vector.extract_strided_slice %46 {offsets = [16, 0], sizes = [8, 8], strides = [1, 1]} : vector<64x8xf32> to vector<8x8xf32>
    %55 = vector.extract_strided_slice %47 {offsets = [0, 16], sizes = [8, 8], strides = [1, 1]} : vector<8x32xf32> to vector<8x8xf32>
    %cst_17 = arith.constant dense<0.000000e+00> : vector<8x8xf32>
    %56 = tpu.matmul %54, %55, %cst_17 {dimension_numbers = #tpu.dot_dimension_numbers<[1], [0], [0], [1], [0, 0, 1, 1], [], []>} : vector<8x8xf32>, vector<8x8xf32>, vector<8x8xf32> -> vector<8x8xf32>
    %57 = vector.extract_strided_slice %46 {offsets = [24, 0], sizes = [8, 8], strides = [1, 1]} : vector<64x8xf32> to vector<8x8xf32>
    %58 = vector.extract_strided_slice %47 {offsets = [0, 24], sizes = [8, 8], strides = [1, 1]} : vector<8x32xf32> to vector<8x8xf32>
    %cst_18 = arith.constant dense<0.000000e+00> : vector<8x8xf32>
    %59 = tpu.matmul %57, %58, %cst_18 {dimension_numbers = #tpu.dot_dimension_numbers<[1], [0], [0], [1], [0, 0, 1, 1], [], []>} : vector<8x8xf32>, vector<8x8xf32>, vector<8x8xf32> -> vector<8x8xf32>
    %60 = tpu.concatenate %50, %53, %56, %59 in 1 : vector<8x8xf32>, vector<8x8xf32>, vector<8x8xf32>, vector<8x8xf32> -> vector<8x32xf32>
    %61 = vector.extract_strided_slice %7 {offsets = [24, 64], sizes = [8, 32], strides = [1, 1]} : vector<32x96xf32> to vector<8x32xf32>
    %62 = vector.extract_strided_slice %46 {offsets = [32, 0], sizes = [8, 8], strides = [1, 1]} : vector<64x8xf32> to vector<8x8xf32>
    %63 = vector.extract_strided_slice %61 {offsets = [0, 0], sizes = [8, 8], strides = [1, 1]} : vector<8x32xf32> to vector<8x8xf32>
    %cst_19 = arith.constant dense<0.000000e+00> : vector<8x8xf32>
    %64 = tpu.matmul %62, %63, %cst_19 {dimension_numbers = #tpu.dot_dimension_numbers<[1], [0], [0], [1], [0, 0, 1, 1], [], []>} : vector<8x8xf32>, vector<8x8xf32>, vector<8x8xf32> -> vector<8x8xf32>
    %65 = vector.extract_strided_slice %46 {offsets = [40, 0], sizes = [8, 8], strides = [1, 1]} : vector<64x8xf32> to vector<8x8xf32>
    %66 = vector.extract_strided_slice %61 {offsets = [0, 8], sizes = [8, 8], strides = [1, 1]} : vector<8x32xf32> to vector<8x8xf32>
    %cst_20 = arith.constant dense<0.000000e+00> : vector<8x8xf32>
    %67 = tpu.matmul %65, %66, %cst_20 {dimension_numbers = #tpu.dot_dimension_numbers<[1], [0], [0], [1], [0, 0, 1, 1], [], []>} : vector<8x8xf32>, vector<8x8xf32>, vector<8x8xf32> -> vector<8x8xf32>
    %68 = vector.extract_strided_slice %46 {offsets = [48, 0], sizes = [8, 8], strides = [1, 1]} : vector<64x8xf32> to vector<8x8xf32>
    %69 = vector.extract_strided_slice %61 {offsets = [0, 16], sizes = [8, 8], strides = [1, 1]} : vector<8x32xf32> to vector<8x8xf32>
    %cst_21 = arith.constant dense<0.000000e+00> : vector<8x8xf32>
    %70 = tpu.matmul %68, %69, %cst_21 {dimension_numbers = #tpu.dot_dimension_numbers<[1], [0], [0], [1], [0, 0, 1, 1], [], []>} : vector<8x8xf32>, vector<8x8xf32>, vector<8x8xf32> -> vector<8x8xf32>
    %71 = vector.extract_strided_slice %46 {offsets = [56, 0], sizes = [8, 8], strides = [1, 1]} : vector<64x8xf32> to vector<8x8xf32>
    %72 = vector.extract_strided_slice %61 {offsets = [0, 24], sizes = [8, 8], strides = [1, 1]} : vector<8x32xf32> to vector<8x8xf32>
    %cst_22 = arith.constant dense<0.000000e+00> : vector<8x8xf32>
    %73 = tpu.matmul %71, %72, %cst_22 {dimension_numbers = #tpu.dot_dimension_numbers<[1], [0], [0], [1], [0, 0, 1, 1], [], []>} : vector<8x8xf32>, vector<8x8xf32>, vector<8x8xf32> -> vector<8x8xf32>
    %74 = tpu.concatenate %64, %67, %70, %73 in 1 : vector<8x8xf32>, vector<8x8xf32>, vector<8x8xf32>, vector<8x8xf32> -> vector<8x32xf32>
    %75 = tpu.concatenate %60, %74 in 0 : vector<8x32xf32>, vector<8x32xf32> -> vector<16x32xf32>
    %76 = vector.extract_strided_slice %1 {offsets = [0, 96], sizes = [32, 32], strides = [1, 1]} : vector<32x128xf32> to vector<32x32xf32>
    %cst_23 = arith.constant dense<0.000000e+00> : vector<16x32xf32>
    %77 = tpu.matmul %75, %76, %cst_23 {dimension_numbers = #tpu.dot_dimension_numbers<[1], [0], [0], [1], [0, 0, 1, 1], [], []>} : vector<16x32xf32>, vector<32x32xf32>, vector<16x32xf32> -> vector<16x32xf32>
    %78 = vector.extract_strided_slice %2 {offsets = [0, 96], sizes = [1, 32], strides = [1, 1]} : vector<1x128xf32> to vector<1x32xf32>
    %79 = vector.broadcast %78 : vector<1x32xf32> to vector<16x32xf32>
    %80 = arith.addf %77, %79 : vector<16x32xf32>
    %c0_24 = arith.constant 0 : index
    %c0_25 = arith.constant 0 : index
    %81 = vector.load %arg3[%c0_24, %c0_25] : memref<16x32xf32, #tpu.memory_space<vmem>>, vector<16x32xf32>
    tpu.vector_store %arg3[%c0_24, %c0_25], %80 {strides = array<i32>} : memref<16x32xf32, #tpu.memory_space<vmem>>, vector<16x32xf32>,
    return
  }
}

</mosaic_0001>

<bundles_post_ra>
// kernel: transformer_decoder_layer2.1
= control target key start
LH: loop header
LB: loop body
LE: loop exit
PB: predicated region body
PF: predicated region fallthrough
CT: control target
= control target key end

     0   :  { %s1150_s0 = inlined_call_operand.vmem [shape: f32[32,32], index: 0, kind: input, shape index: {}]   ;;  %s1151_s1 = inlined_call_operand.vmem [shape: f32[32,128], index: 1, kind: input, shape index: {}]   ;;  %s1152_s2 = inlined_call_operand.vmem [shape: f32[1,128], index: 2, kind: input, shape index: {}]   ;;  %s1153_s3 = inlined_call_operand.hbm [shape: f32[16,32], index: 3, kind: output, shape index: {}]  }
   0x1   :  { %v955_v0 = vld [vmem:[%s1151_s1 + $0x18] sm:$0xff]  ;;  %v960_v1 = vld [vmem:[%s1151_s1 + $0x10] sm:$0xff]  ;;  %v968_v3 = vld [vmem:[%s1151_s1 + $0x8] sm:$0xff] }
   0x2   :  { %52 = vmatpush.msra.mxu0 %v955_v0  ;;  %v846_v2 = vpack.i.bf16 %v960_v1, %v955_v0  ;;  %v973_v4 = vld [vmem:[%s1151_s1] sm:$0xff] }
   0x3   :  { %v851_v5 = vpack.i.bf16 %v973_v4, %v968_v3 }
   0x4   :  { %53 = vmatpush.msra.mxu0 %v960_v1 }
   0x5   :  { %8 = vsyncpa [#allocation3], 0  ;;  %v15_v6 = vld [vmem:[%s1150_s0] sm:$0xff]  ;;  %vm27_vm0 = vcmask 261120   ;;  %v16_v7 = vld [vmem:[%s1150_s0 + $0x8] sm:$0xff]  ;;  %s915_s29 = smov 112  }
   0x6   :  { %54 = vmatpush.msra.mxu0 %v968_v3  ;;  %v17_v8 = vld [vmem:[%s1150_s0 + $0x10] sm:$0xff]  ;;  %v18_v9 = vld [vmem:[%s1150_s0 + $0x18] sm:$0xff]  ;;  %v999_v10 = vld [vmem:[%s1152_s2] ss:$0 sm:$0xff]  ;;  %s916_s30 = smov 120   ;;  %s917_s0 = smov 96  }
   0x7   :  { %s918_s4 = smov 72   ;;  %s919_s2 = smov 80   ;;  %vm72_vm1 = vcmask 64512  }
   0x8   :  { %55 = vmatpush.msra.mxu0 %v973_v4  ;;  %s920_s5 = smov 88   ;;  %s921_s6 = smov 104  }
   0x9   :  { %794 = vmatmul.msk.f32.vlgmr.msra.gmra.mxu0 %vm27_vm0, %v15_v6  ;;  %s922_s7 = smov 64   ;;  %s923_s8 = smov 48  }
   0xa   :  { %s924_s9 = smov 56   ;;  %s925_s10 = smov 40  }
   0xb   :  { %s926_s11 = smov 32   ;;  %s927_s12 = smov 16  }
   0xc   :  { %s928_s13 = smov 8   ;;  %s929_s14 = smov 24  }
   0xd   :  { %s782_s17 = sshll.u32 %s1153_s3, 4  ;;  %s930_s18 = smov [#allocation2]   ;;  %s783_s17 = int_to_ptr.hbm [resolvable:$true] %s782_s17 }
   0xe   :  { %s780_s19 = sshll.u32 %s930_s18, 4  ;;  %s931_s20 = smov 128   ;;  %s781_s19 = int_to_ptr.vmem [resolvable:$true] %s780_s19 }
  0x11   :  { %795 = vmatmul.msk.f32.gmra.mxu0 %vm27_vm0, %v16_v7 }
  0x19   :  { %796 = vmatmul.msk.f32.gmra.mxu0 %vm27_vm0, %v17_v8 }
  0x21   :  { %797 = vmatmul.msk.f32.gmra.mxu0 %vm27_vm0, %v18_v9 }
  0x86   :  { %v57_v11 = vpop.f32.mrf.mxu0 }
  0x87   :  { %v58_v12 = vadd.f32 %v999_v10, %v57_v11 }
  0x89   :  { %126 = vrot.lane.b32.xlu2 %v58_v12, %s915_s29  ;;  %98 = vrot.lane.b32.xlu1 %v58_v12, %s916_s30 }
  0x8e   :  { %v60_v13 = vpop.f32.mrf.mxu0 }
  0x8f   :  { %v61_v18 = vadd.f32 %v999_v10, %v60_v13 }
  0x96   :  { %v63_v14 = vpop.f32.mrf.mxu0 }
  0x97   :  { %v1003_v15 = vadd.f32 %v999_v10, %v63_v14 }
  0x99   :  { %70 = vrot.lane.b32.xlu0 %v1003_v15, %s917_s0  ;;  %156 = vrot.lane.b32.xlu2 %v1003_v15, %s918_s4 }
  0x9a   :  { %128 = vrot.lane.b32.xlu1 %v1003_v15, %s919_s2 }
  0x9e   :  { %v66_v16 = vpop.f32.mrf.mxu0 }
  0x9f   :  { %v1009_v17 = vadd.f32 %v999_v10, %v66_v16 }
  0xa1   :  { %100 = vrot.lane.b32.xlu0 %v1003_v15, %s920_s5  ;;  %154 = vrot.lane.b32.xlu2 %v58_v12, %s921_s6 }
  0xa2   :  { %212 = vrot.lane.b32.xlu1 %v1009_v17, %s920_s5 }
  0xa9   :  { %183 = vrot.lane.b32.xlu0 %v1009_v17, %s917_s0  ;;  %268 = vrot.lane.b32.xlu2 %v1009_v17, %s918_s4 }
  0xaa   :  { %240 = vrot.lane.b32.xlu1 %v1009_v17, %s919_s2 }
  0xb1   :  { %210 = vrot.lane.b32.xlu0 %v61_v18, %s916_s30 }
  0xb2   :  { %266 = vrot.lane.b32.xlu1 %v61_v18, %s921_s6 }
  0xb9   :  { %238 = vrot.lane.b32.xlu0 %v61_v18, %s915_s29 }
  0xe3   :  { %v127_v19 = vpop.permute.xlu2 %126 }
  0xf3   :  { %v157_v20 = vpop.permute.xlu2 %156 }
  0xf4   :  { %804 = vmatpush.xpose.msk.msra.mxu1 %vm72_vm1, %v157_v20 }
  0xfb   :  { %v155_v21 = vpop.permute.xlu2 %154  ;;  %v99_v22 = vpop.permute.xlu1 %98 }
  0xfc   :  { %805 = vmatmul.msk.f32.vlgmr.msra.gmra.mxu1 %vm72_vm1, %v155_v21 }
 0x103   :  { %v269_v28 = vpop.permute.xlu2 %268 }
 0x10b   :  { %v71_v23 = vpop.permute.xlu0 %70 }
 0x10c   :  { %v129_v24 = vpop.permute.xlu1 %128  ;;  %798 = vmatpush.xpose.msk.msra.mxu2 %vm72_vm1, %v71_v23 }
 0x10d   :  { %802 = vmatpush.xpose.msk.msra.mxu3 %vm72_vm1, %v129_v24 }
 0x10f   :  { %799 = vmatmul.msk.f32.vlgmr.msra.gmra.mxu2 %vm72_vm1, %v58_v12 }
 0x110   :  { %803 = vmatmul.msk.f32.vlgmr.msra.gmra.mxu3 %vm72_vm1, %v127_v19 }
 0x113   :  { %v101_v25 = vpop.permute.xlu0 %100 }
 0x114   :  { %v213_v26 = vpop.permute.xlu1 %212  ;;  %800 = vmatpush.xpose.msk.msrb.mxu2 %vm72_vm1, %v101_v25 }
 0x115   :  { %808 = vmatpush.xpose.msk.msrb.mxu3 %vm72_vm1, %v213_v26 }
 0x117   :  { %801 = vmatmul.msk.f32.vlgmr.msrb.gmra.mxu2 %vm72_vm1, %v99_v22 }
 0x11b   :  { %v184_v27 = vpop.permute.xlu0 %183 }
 0x11c   :  { %v241_v29 = vpop.permute.xlu1 %240  ;;  %806 = vmatpush.xpose.msk.msra.mxu2 %vm72_vm1, %v184_v27 }
 0x11d   :  { %810 = vmatpush.xpose.msk.msrb.mxu1 %vm72_vm1, %v241_v29 }
 0x11f   :  { %807 = vmatmul.msk.f32.vlgmr.msra.gmra.mxu2 %vm72_vm1, %v61_v18 }
 0x120   :  { %812 = vmatpush.xpose.msk.msrb.mxu2 %vm72_vm1, %v269_v28 }
 0x123   :  { %v211_v30 = vpop.permute.xlu0 %210 }
 0x124   :  { %809 = vmatmul.msk.f32.vlgmr.msrb.gmra.mxu3 %vm72_vm1, %v211_v30  ;;  %v267_v31 = vpop.permute.xlu1 %266  ;;  %v841_v30 = vpack.i.bf16 %v1009_v17, %v1003_v15 }
 0x127   :  { %813 = vmatmul.msk.f32.vlgmr.msrb.gmra.mxu2 %vm72_vm1, %v267_v31 }
 0x12b   :  { %v239_v32 = vpop.permute.xlu0 %238 }
 0x12c   :  { %811 = vmatmul.msk.f32.vlgmr.msrb.gmra.mxu1 %vm72_vm1, %v239_v32 }
 0x179   :  { %v179_v33 = vpop.f32.mrf.mxu1 }
 0x17a   :  { %v303_v34 = vsel %vm72_vm1, %v179_v33, -inf }
 0x17b   :  { %304 = vmax.xlane.f32.xlu1 %v303_v34 }
 0x192   :  { %v95_v35 = vpop.f32.mrf.mxu2 }
 0x193   :  { %v151_v36 = vpop.f32.mrf.mxu3  ;;  %v294_v37 = vsel %vm72_vm1, %v95_v35, -inf }
 0x194   :  { %v300_v38 = vsel %vm72_vm1, %v151_v36, -inf  ;;  %295 = vmax.xlane.f32.xlu2 %v294_v37 }
 0x195   :  { %301 = vmax.xlane.f32.xlu0 %v300_v38 }
 0x19a   :  { %v123_v39 = vpop.f32.mrf.mxu2 }
 0x19b   :  { %v297_v40 = vsel %vm72_vm1, %v123_v39, -inf }
 0x19c   :  { %298 = vmax.xlane.f32.xlu2 %v297_v40 }
 0x1a2   :  { %v1037_v41 = vpop.f32.mrf.mxu2 }
 0x1a3   :  { %v306_v42 = vsel %vm72_vm1, %v1037_v41, -inf }
 0x1a4   :  { %307 = vmax.xlane.f32.xlu1 %v306_v42 }
 0x1a7   :  { %v235_v43 = vpop.f32.mrf.mxu3 }
 0x1a8   :  { %v309_v44 = vsel %vm72_vm1, %v235_v43, -inf }
 0x1a9   :  { %v263_v45 = vpop.f32.mrf.mxu1  ;;  %310 = vmax.xlane.f32.xlu2 %v309_v44 }
 0x1aa   :  { %v291_v46 = vpop.f32.mrf.mxu2  ;;  %v312_v47 = vsel %vm72_vm1, %v263_v45, -inf }
 0x1ab   :  { %313 = vmax.xlane.f32.xlu0 %v312_v47  ;;  %v315_v48 = vsel %vm72_vm1, %v291_v46, -inf }
 0x1ac   :  { %316 = vmax.xlane.f32.xlu1 %v315_v48 }
 0x1bf   :  { %486 = vrot.lane.b32.xlu0 %v1003_v15, %s922_s7 }
 0x1c1   :  { %538 = vrot.lane.b32.xlu2 %v1003_v15, %s923_s8 }
 0x1ee   :  { %v305_v49 = vpop.xlane.xlu1 %304 }
 0x1ef   :  { %v321_v50 = vsub.f32 %v179_v33, %v305_v49 }
 0x1f1   :  { %v332_v51 = vmul.f32 1.442695, %v321_v50 }
 0x1f3   :  { %857 = vpow2.f32 %v332_v51 }
 0x1f9   :  { %v1048_v52 = vpop.eup %857 }
 0x1fa   :  { %v351_v53 = vsel %vm72_vm1, %v1048_v52, 0.0 }
 0x1fb   :  { %352 = vadd.xlane.f32.xlu2 %v351_v53 }
 0x207   :  { %v296_v54 = vpop.xlane.xlu2 %295 }
 0x208   :  { %v302_v55 = vpop.xlane.xlu0 %301  ;;  %v318_v56 = vsub.f32 %v95_v35, %v296_v54 }
 0x209   :  { %v320_v57 = vsub.f32 %v151_v36, %v302_v55 }
 0x20a   :  { %v326_v58 = vmul.f32 1.442695, %v318_v56 }
 0x20b   :  { %v330_v59 = vmul.f32 1.442695, %v320_v57 }
 0x20c   :  { %859 = vpow2.f32 %v326_v58 }
 0x20d   :  { %861 = vpow2.f32 %v330_v59 }
 0x20f   :  { %v299_v60 = vpop.xlane.xlu2 %298 }
 0x210   :  { %v319_v61 = vsub.f32 %v123_v39, %v299_v60 }
 0x212   :  { %v1052_v62 = vpop.eup %859  ;;  %v328_v63 = vmul.f32 1.442695, %v319_v61 }
 0x213   :  { %v1054_v6 = vpop.eup %861  ;;  %v342_v7 = vsel %vm72_vm1, %v1052_v62, 0.0 }
 0x214   :  { %863 = vpow2.f32 %v328_v63  ;;  %v348_v8 = vsel %vm72_vm1, %v1054_v6, 0.0  ;;  %343 = vadd.xlane.f32.xlu2 %v342_v7 }
 0x215   :  { %349 = vadd.xlane.f32.xlu0 %v348_v8 }
 0x217   :  { %v308_v9 = vpop.xlane.xlu1 %307 }
 0x218   :  { %v322_v33 = vsub.f32 %v1037_v41, %v308_v9 }
 0x21a   :  { %v1060_v11 = vpop.eup %863  ;;  %v334_v34 = vmul.f32 1.442695, %v322_v33 }
 0x21b   :  { %v345_v12 = vsel %vm72_vm1, %v1060_v11, 0.0 }
 0x21c   :  { %v311_v13 = vpop.xlane.xlu2 %310 }
 0x21d   :  { %346 = vadd.xlane.f32.xlu0 %v345_v12  ;;  %v323_v14 = vsub.f32 %v235_v43, %v311_v13 }
 0x21e   :  { %v314_v16 = vpop.xlane.xlu0 %313 }
 0x21f   :  { %v336_v18 = vmul.f32 1.442695, %v323_v14  ;;  %v324_v19 = vsub.f32 %v263_v45, %v314_v16  ;;  %v317_v20 = vpop.xlane.xlu1 %316 }
 0x220   :  { %v325_v21 = vsub.f32 %v291_v46, %v317_v20 }
 0x221   :  { %865 = vpow2.f32 %v336_v18  ;;  %v338_v22 = vmul.f32 1.442695, %v324_v19 }
 0x222   :  { %v340_v23 = vmul.f32 1.442695, %v325_v21 }
 0x223   :  { %867 = vpow2.f32 %v338_v22 }
 0x224   :  { %v539_v24 = vpop.permute.xlu2 %538  ;;  %869 = vpow2.f32 %v340_v23 }
 0x225   :  { %559 = vmatpush.msra.mxu2 %v539_v24  ;;  %871 = vpow2.f32 %v334_v34 }
 0x227   :  { %v1064_v25 = vpop.eup %865 }
 0x228   :  { %v357_v26 = vsel %vm72_vm1, %v1064_v25, 0.0 }
 0x229   :  { %v1068_v27 = vpop.eup %867  ;;  %358 = vadd.xlane.f32.xlu1 %v357_v26 }
 0x22a   :  { %v360_v28 = vsel %vm72_vm1, %v1068_v27, 0.0  ;;  %v1072_v29 = vpop.eup %869 }
 0x22b   :  { %361 = vadd.xlane.f32.xlu2 %v360_v28  ;;  %v363_v31 = vsel %vm72_vm1, %v1072_v29, 0.0  ;;  %v1085_v35 = vpop.eup %871 }
 0x22c   :  { %v354_v36 = vsel %vm72_vm1, %v1085_v35, 0.0 }
 0x231   :  { %842 = vrot.lane.b32.xlu0 %v841_v30, %s924_s9  ;;  %v487_v32 = vpop.permute.xlu0 %486  ;;  %364 = vadd.xlane.f32.xlu1 %v363_v31 }
 0x232   :  { %507 = vmatpush.msra.mxu3 %v487_v32 }
 0x239   :  { %659 = vrot.lane.b32.xlu0 %v1009_v17, %s923_s8 }
 0x241   :  { %607 = vrot.lane.b32.xlu0 %v1009_v17, %s922_s7 }
 0x243   :  { %685 = vrot.lane.b32.xlu2 %v1009_v17, %s925_s10 }
 0x24a   :  { %564 = vrot.lane.b32.xlu1 %v1003_v15, %s925_s10 }
 0x24b   :  { %847 = vrot.lane.b32.xlu2 %v846_v2, %s926_s11 }
 0x253   :  { %852 = vrot.lane.b32.xlu2 %v851_v5, %s926_s11 }
 0x26e   :  { %v1089_v37 = vpop.xlane.xlu2 %352 }
 0x274   :  { %355 = vadd.xlane.f32.xlu1 %v354_v36 }
 0x287   :  { %v344_v38 = vpop.xlane.xlu2 %343 }
 0x288   :  { %v350_v39 = vpop.xlane.xlu0 %349  ;;  %873 = vrcp.f32 %v344_v38  ;;  %v377_v45 = vand.u32 2147483648, %v344_v38  ;;  %v375_v48 = vand.u32 2147483647, %v344_v38  ;;  %vm371_vm4 = vweird.f32 %v344_v38 }
 0x289   :  { %875 = vrcp.f32 %v350_v39  ;;  %v405_v46 = vand.u32 2147483648, %v350_v39  ;;  %v403_v50 = vand.u32 2147483647, %v350_v39  ;;  %vm399_vm5 = vweird.f32 %v350_v39 }
 0x28a   :  { %v378_v54 = vor.u32 1.1754944e-38, %v377_v45  ;;  %vm376_vm8 = vcmp.eq.f32.partialorder %v375_v48, 8.507059e+37 }
 0x28b   :  { %v406_v56 = vor.u32 1.1754944e-38, %v405_v46  ;;  %vm404_vm9 = vcmp.eq.f32.partialorder %v403_v50, 8.507059e+37 }
 0x28e   :  { %v874_v40 = vpop.eup %873 }
 0x28f   :  { %v876_v17 = vpop.eup %875  ;;  %v367_v42 = vmul.f32 %v874_v40, %v344_v38  ;;  %vm372_vm2 = vweird.f32 %v874_v40 }
 0x290   :  { %v395_v15 = vmul.f32 %v876_v17, %v350_v39  ;;  %v347_v43 = vpop.xlane.xlu0 %346  ;;  %vm400_vm3 = vweird.f32 %v876_v17  ;;  %vm373_vm6 = vmor %vm371_vm4, %vm372_vm2 }
 0x291   :  { %v368_v41 = vsub.f32 1.0, %v367_v42  ;;  %877 = vrcp.f32 %v347_v43  ;;  %vm401_vm7 = vmor %vm399_vm5, %vm400_vm3  ;;  %v391_v12 = vand.u32 2147483648, %v347_v43  ;;  %v389_v14 = vand.u32 2147483647, %v347_v43 }
 0x292   :  { %v396_v44 = vsub.f32 1.0, %v395_v15  ;;  %879 = vrcp.f32 %v1089_v37  ;;  %vm385_vm11 = vweird.f32 %v347_v43 }
 0x293   :  { %v369_v47 = vmul.f32 %v874_v40, %v368_v41  ;;  %v392_v19 = vor.u32 1.1754944e-38, %v391_v12  ;;  %vm390_vm13 = vcmp.eq.f32.partialorder %v389_v14, 8.507059e+37 }
 0x294   :  { %v397_v49 = vmul.f32 %v876_v17, %v396_v44 }
 0x295   :  { %v370_v51 = vadd.f32 %v874_v40, %v369_v47 }
 0x296   :  { %v398_v53 = vadd.f32 %v876_v17, %v397_v49 }
 0x297   :  { %v878_v55 = vpop.eup %877  ;;  %v374_v57 = vsel %vm373_vm6, %v874_v40, %v370_v51 }
 0x298   :  { %v402_v58 = vsel %vm401_vm7, %v876_v17, %v398_v53  ;;  %v379_v59 = vsel %vm376_vm8, %v378_v54, %v374_v57  ;;  %v381_v60 = vmul.f32 %v878_v55, %v347_v43  ;;  %vm386_vm10 = vweird.f32 %v878_v55 }
 0x299   :  { %v407_v61 = vsel %vm404_vm9, %v406_v56, %v402_v58  ;;  %v478_v63 = vmul.f32 %v1052_v62, %v379_v59  ;;  %vm387_vm12 = vmor %vm385_vm11, %vm386_vm10  ;;  %vm413_vm8 = vweird.f32 %v1089_v37 }
 0x29a   :  { %v382_v7 = vsub.f32 1.0, %v381_v60  ;;  %v480_v8 = vmul.f32 %v1054_v6, %v407_v61  ;;  %v1098_v6 = vpop.eup %879 }
 0x29b   :  { %814 = vmatmul.msk.f32.vlgmr.msra.gmra.mxu3 %vm72_vm1, %v478_v63  ;;  %v409_v31 = vmul.f32 %v1098_v6, %v1089_v37  ;;  %vm414_vm5 = vweird.f32 %v1098_v6 }
 0x29c   :  { %v383_v9 = vmul.f32 %v878_v55, %v382_v7  ;;  %816 = vmatmul.msk.f32.vlgmr.msra.gmra.mxu2 %vm72_vm1, %v480_v8  ;;  %v359_v13 = vpop.xlane.xlu1 %358  ;;  %vm415_vm10 = vmor %vm413_vm8, %vm414_vm5 }
 0x29d   :  { %881 = vrcp.f32 %v359_v13  ;;  %v447_v34 = vand.u32 2147483648, %v359_v13  ;;  %v445_v38 = vand.u32 2147483647, %v359_v13  ;;  %v410_v39 = vsub.f32 1.0, %v409_v31 }
 0x29e   :  { %v384_v16 = vadd.f32 %v878_v55, %v383_v9  ;;  %v1096_v18 = vpop.xlane.xlu2 %361  ;;  %vm441_vm15 = vweird.f32 %v359_v13 }
 0x29f   :  { %883 = vrcp.f32 %v1096_v18  ;;  %v448_v42 = vor.u32 1.1754944e-38, %v447_v34  ;;  %vm446_vm3 = vcmp.eq.f32.partialorder %v445_v38, 8.507059e+37  ;;  %v411_v45 = vmul.f32 %v1098_v6, %v410_v39 }
 0x2a0   :  { %v388_v62 = vsel %vm387_vm12, %v878_v55, %v384_v16  ;;  %v417_v55 = vand.u32 2147483647, %v1089_v37  ;;  %v459_v61 = vand.u32 2147483647, %v1096_v18 }
 0x2a1   :  { %v393_v20 = vsel %vm390_vm13, %v392_v19, %v388_v62  ;;  %v412_v49 = vadd.f32 %v1098_v6, %v411_v45  ;;  %vm455_vm13 = vweird.f32 %v1096_v18 }
 0x2a2   :  { %v479_v30 = vmul.f32 %v1060_v11, %v393_v20  ;;  %vm418_vm11 = vcmp.eq.f32.partialorder %v417_v55, 8.507059e+37 }
 0x2a3   :  { %v882_v21 = vpop.eup %881  ;;  %v843_v22 = vpop.permute.xlu0 %842  ;;  %v416_v4 = vsel %vm415_vm10, %v1098_v6, %v412_v49 }
 0x2a4   :  { %v437_v23 = vmul.f32 %v882_v21, %v359_v13  ;;  %v845_v24 = vunpack.i.h.bf16 %v843_v22  ;;  %v844_v26 = vunpack.i.l.bf16 %v843_v22  ;;  %v365_v28 = vpop.xlane.xlu1 %364  ;;  %vm442_vm14 = vweird.f32 %v882_v21 }
 0x2a5   :  { %885 = vrcp.f32 %v365_v28  ;;  %v884_v11 = vpop.eup %883  ;;  %vm443_vm2 = vmor %vm441_vm15, %vm442_vm14  ;;  %v475_v1 = vand.u32 2147483648, %v365_v28  ;;  %v473_v48 = vand.u32 2147483647, %v365_v28  ;;  %vm469_vm6 = vweird.f32 %v365_v28 }
 0x2a6   :  { %v438_v32 = vsub.f32 1.0, %v437_v23  ;;  %533 = vmatpush.msra.mxu1 %v844_v26  ;;  %654 = vmatpush.msrb.mxu2 %v845_v24  ;;  %v686_v33 = vpop.permute.xlu2 %685  ;;  %v451_v46 = vmul.f32 %v884_v11, %v1096_v18  ;;  %vm456_vm12 = vweird.f32 %v884_v11  ;;  %vm460_vm15 = vcmp.eq.f32.partialorder %v459_v61, 8.507059e+37 }
 0x2a7   :  { %815 = vmatmul.msk.f32.vlgmr.msra.gmra.mxu1 %vm72_vm1, %v479_v30  ;;  %706 = vmatpush.msrb.mxu0 %v686_v33  ;;  %v476_v53 = vor.u32 1.1754944e-38, %v475_v1  ;;  %vm474_vm9 = vcmp.eq.f32.partialorder %v473_v48, 8.507059e+37  ;;  %vm457_vm14 = vmor %vm455_vm13, %vm456_vm12 }
 0x2a8   :  { %v439_v36 = vmul.f32 %v882_v21, %v438_v32  ;;  %v452_v50 = vsub.f32 1.0, %v451_v46 }
 0x2aa   :  { %v440_v40 = vadd.f32 %v882_v21, %v439_v36  ;;  %v453_v5 = vmul.f32 %v884_v11, %v452_v50 }
 0x2ab   :  { %v886_v17 = vpop.eup %885  ;;  %v660_v15 = vpop.permute.xlu0 %659 }
 0x2ac   :  { %v444_v43 = vsel %vm443_vm2, %v882_v21, %v440_v40  ;;  %v465_v41 = vmul.f32 %v886_v17, %v365_v28  ;;  %vm470_vm4 = vweird.f32 %v886_v17  ;;  %v454_v60 = vadd.f32 %v884_v11, %v453_v5 }
 0x2ad   :  { %v449_v44 = vsel %vm446_vm3, %v448_v42, %v444_v43  ;;  %vm471_vm7 = vmor %vm469_vm6, %vm470_vm4  ;;  %vm603_vm6 = vcmask 130048  }
 0x2ae   :  { %v466_v47 = vsub.f32 1.0, %v465_v41  ;;  %v483_v0 = vmul.f32 %v1064_v25, %v449_v44  ;;  %v419_v25 = vand.u32 2147483648, %v1089_v37  ;;  %v461_v37 = vand.u32 2147483648, %v1096_v18 }
 0x2af   :  { %v458_v8 = vsel %vm457_vm14, %v884_v11, %v454_v60 }
 0x2b0   :  { %v467_v2 = vmul.f32 %v886_v17, %v466_v47  ;;  %819 = vmatmul.msk.f32.vlgmr.msrb.gmra.mxu2 %vm72_vm1, %v483_v0  ;;  %v420_v58 = vor.u32 1.1754944e-38, %v419_v25 }
 0x2b2   :  { %v468_v51 = vadd.f32 %v886_v17, %v467_v2  ;;  %v421_v59 = vsel %vm418_vm11, %v420_v58, %v416_v4 }
 0x2b3   :  { %v608_v54 = vpop.permute.xlu0 %607  ;;  %v481_v7 = vmul.f32 %v1048_v52, %v421_v59 }
 0x2b4   :  { %628 = vmatpush.msrb.mxu1 %v608_v54  ;;  %v472_v56 = vsel %vm471_vm7, %v886_v17, %v468_v51  ;;  %vm605_vm7 = vcmask 195584  }
 0x2b5   :  { %v477_v3 = vsel %vm474_vm9, %v476_v53, %v472_v56 }
 0x2b6   :  { %v485_v57 = vmul.f32 %v1072_v29, %v477_v3  ;;  %v462_v29 = vor.u32 1.1754944e-38, %v461_v37 }
 0x2b8   :  { %821 = vmatmul.msk.f32.vlgmr.msrb.gmra.mxu0 %vm72_vm1, %v485_v57  ;;  %v463_v9 = vsel %vm460_vm15, %v462_v29, %v458_v8 }
 0x2b9   :  { %v484_v12 = vmul.f32 %v1068_v27, %v463_v9 }
 0x2bc   :  { %v565_v63 = vpop.permute.xlu1 %564 }
 0x2bd   :  { %585 = vmatpush.msrb.mxu3 %v565_v63 }
 0x2be   :  { %817 = vmatmul.msk.f32.vlgmr.msrb.gmra.mxu3 %vm72_vm1, %v481_v7 }
 0x2bf   :  { %680 = vmatpush.msra.mxu3 %v660_v15 }
 0x2c6   :  { %820 = vmatmul.msk.f32.vlgmr.msra.gmra.mxu3 %vm72_vm1, %v484_v12 }
 0x2e7   :  { %v356_v13 = vpop.xlane.xlu1 %355 }
 0x2e8   :  { %887 = vrcp.f32 %v356_v13  ;;  %v433_v62 = vand.u32 2147483648, %v356_v13  ;;  %v431_v19 = vand.u32 2147483647, %v356_v13  ;;  %vm427_vm3 = vweird.f32 %v356_v13 }
 0x2ea   :  { %v434_v20 = vor.u32 1.1754944e-38, %v433_v62  ;;  %vm432_vm5 = vcmp.eq.f32.partialorder %v431_v19, 8.507059e+37 }
 0x2ee   :  { %v888_v14 = vpop.eup %887 }
 0x2ef   :  { %v423_v16 = vmul.f32 %v888_v14, %v356_v13  ;;  %vm428_vm2 = vweird.f32 %v888_v14 }
 0x2f0   :  { %vm429_vm4 = vmor %vm427_vm3, %vm428_vm2 }
 0x2f1   :  { %v424_v18 = vsub.f32 1.0, %v423_v16 }
 0x2f3   :  { %v425_v52 = vmul.f32 %v888_v14, %v424_v18 }
 0x2f5   :  { %v426_v6 = vadd.f32 %v888_v14, %v425_v52 }
 0x2f7   :  { %v430_v21 = vsel %vm429_vm4, %v888_v14, %v426_v6 }
 0x2f8   :  { %v435_v22 = vsel %vm432_vm5, %v434_v20, %v430_v21 }
 0x2f9   :  { %v482_v27 = vmul.f32 %v1085_v35, %v435_v22  ;;  %v848_v35 = vpop.permute.xlu2 %847 }
 0x2fa   :  { %v850_v33 = vunpack.i.h.bf16 %v848_v35  ;;  %v849_v34 = vunpack.i.l.bf16 %v848_v35 }
 0x2fb   :  { %818 = vmatmul.msk.f32.vlgmr.msrb.gmra.mxu1 %vm72_vm1, %v482_v27 }
 0x2fc   :  { %763 = vmatpush.msra.mxu1 %v849_v34 }
 0x2fe   :  { %764 = vmatpush.msra.mxu1 %v850_v33 }
 0x301   :  { %v853_v36 = vpop.permute.xlu2 %852 }
 0x302   :  { %v855_v38 = vunpack.i.h.bf16 %v853_v36  ;;  %v854_v11 = vunpack.i.l.bf16 %v853_v36 }
 0x304   :  { %765 = vmatpush.msra.mxu1 %v854_v11 }
 0x306   :  { %766 = vmatpush.msra.mxu1 %v855_v38 }
 0x31e   :  { %v509_v28 = vpop.f32.mrf.mxu3 }
 0x31f   :  { %v561_v23 = vpop.f32.mrf.mxu2 }
 0x320   :  { %595 = vrot.lane.b32.xlu0 %v561_v23, %s927_s12 }
 0x324   :  { %v535_v24 = vpop.f32.mrf.mxu1 }
 0x328   :  { %591 = vrot.lane.b32.xlu0 %v535_v24, %s928_s13 }
 0x333   :  { %v656_v26 = vpop.f32.mrf.mxu2 }
 0x334   :  { %712 = vrot.lane.b32.xlu0 %v656_v26, %s928_s13 }
 0x335   :  { %v708_v30 = vpop.f32.mrf.mxu0 }
 0x33c   :  { %720 = vrot.lane.b32.xlu0 %v708_v30, %s929_s14 }
 0x341   :  { %v587_v31 = vpop.f32.mrf.mxu3 }
 0x342   :  { %599 = vrot.lane.b32.xlu2 %v587_v31, %s929_s14 }
 0x349   :  { %v682_v32 = vpop.f32.mrf.mxu3 }
 0x34a   :  { %716 = vrot.lane.b32.xlu2 %v682_v32, %s927_s12 }
 0x352   :  { %742 = vrot.lane.b32.xlu2 %v999_v10, %s926_s11 }
 0x378   :  { %v630_v41 = vpop.f32.mrf.mxu1 }
 0x392   :  { %v596_v39 = vpop.permute.xlu0 %595 }
 0x39a   :  { %v592_v40 = vpop.permute.xlu0 %591 }
 0x39b   :  { %v602_v17 = vsel %vm72_vm1, %v509_v28, %v592_v40 }
 0x39c   :  { %v604_v42 = vsel %vm603_vm6, %v602_v17, %v596_v39  ;;  %v600_v15 = vpop.permute.xlu2 %599 }
 0x39d   :  { %v606_v43 = vsel %vm605_vm7, %v604_v42, %v600_v15 }
 0x39e   :  { %822 = vmatmul.msk.f32.vlgmr.msra.gmra.mxu1 %vm27_vm0, %v606_v43 }
 0x3a4   :  { %v717_v45 = vpop.permute.xlu2 %716 }
 0x3a6   :  { %v713_v10 = vpop.permute.xlu0 %712 }
 0x3a7   :  { %v723_v44 = vsel %vm72_vm1, %v630_v41, %v713_v10 }
 0x3a8   :  { %v724_v47 = vsel %vm603_vm6, %v723_v44, %v717_v45 }
 0x3ac   :  { %v743_v1 = vpop.permute.xlu2 %742 }
 0x3ae   :  { %v721_v46 = vpop.permute.xlu0 %720 }
 0x3af   :  { %v725_v0 = vsel %vm605_vm7, %v724_v47, %v721_v46 }
 0x3b0   :  { %823 = vmatmul.msk.f32.gmra.mxu1 %vm27_vm0, %v725_v0 }
 0x41b   :  { %v768_v2 = vpop.f32.mrf.mxu1 }
 0x41c   :  { %v769_v48 = vadd.f32 %v768_v2, %v743_v1 }
 0x41e   :  { %774 = vst.msk [vmem:[#allocation2] sm:$0xff] %vm27_vm0, %v769_v48 }
 0x42d   :  { %v771_v49 = vpop.f32.mrf.mxu1 }
 0x42e   :  { %v772_v50 = vadd.f32 %v771_v49, %v743_v1 }
 0x430   :  { %775 = vst.msk [vmem:[#allocation2 + $0x8] sm:$0xff] %vm27_vm0, %v772_v50 }
 0x431   :  { %788 = dma.vmem_to_hbm [thread:$0]  %s781_s19, 256, %s783_s17, [#allocation3], %s931_s20, %s931_s20, %s928_s13  }
 0x432   :  { %913 = dma.done.wait [#allocation3], 256  }
 0x433   :  { %914 = vsyncadd [#allocation3], 4294967040 }
 0x434   :  { %793 = vsyncpa [#allocation3], 1 }

</bundles_post_ra>
